<compile_context>
chip_gen: v6e
topology: v6e:2x2x1
jax: 0.10.0
libtpu: 0.0.40
codegen_flags: <defaults>
</compile_context>

<pallas_src>
import functools

import jax
import jax.numpy as jnp
from jax.experimental import pallas as pl
from jax.experimental.pallas import tpu as pltpu

LANES = 128


def _round_up(a, b):
    return pl.cdiv(a, b) * b


def _mlp_kernel(x_ref, p_ref, out_ref, *, n_state, r_wh, r_bias, out_w):
    x = x_ref[...].astype(jnp.float32)                       # (TILE_B, n_state)

    # Static, full-lane views into the packed parameter blob.
    w1 = p_ref[0:n_state, :]                                 # (n_state, 128)  [W1 | 0]
    wh = p_ref[r_wh:r_wh + LANES, :]                         # (128, 128)      [Wa|Wc|0 ; 0]
    b1 = p_ref[r_bias + 0:r_bias + 1, :]                     # (1, 128)        [b1 | 0]
    bh = p_ref[r_bias + 1:r_bias + 2, :]                     # (1, 128)        [ba|bc|0]
    neg = p_ref[r_bias + 2:r_bias + 3, :]                    # (1, 128)  0 on actor lanes, -1e30 else
    csel = p_ref[r_bias + 3:r_bias + 4, :]                   # (1, 128)  1.0 at lane n_action

    # Hidden layer: Linear(n_state, 64) + ReLU, computed on a full 128-lane slab.
    h = jnp.dot(x, w1, preferred_element_type=jnp.float32) + b1
    h = jnp.maximum(h, 0.0)                                  # (TILE_B, 128)

    # Fused actor+critic head: one matmul; actor logits in lanes [0, n_action),
    # critic value in lane n_action, zeros elsewhere.
    fused = jnp.dot(h, wh, preferred_element_type=jnp.float32) + bh

    # Numerically-stable softmax over actor lanes only (masked via -1e30 row;
    # exp underflows to exactly 0 on masked lanes, so the sum covers only
    # the real actions).
    logits = fused + neg
    m = jnp.max(logits, axis=1, keepdims=True)
    e = jnp.exp(logits - m)
    denom = jnp.sum(e, axis=1, keepdims=True)
    probs = e / denom                                        # exact (unbiased for A2C)

    # probs is already 0 on non-actor lanes; add raw critic on its lane and
    # store only the narrow used lane range.
    out = probs + fused * csel
    out_ref[...] = out[:, :out_w].astype(out_ref.dtype)


def pack_params(w1, b1, wa, ba, wc, bc):
    """Pack all parameters into one (P, 128) f32 blob (call once per weight update).

    w1: (n_state, 64); b1: (1, 64); wa: (64, n_action); ba: (1, n_action);
    wc: (64, 1); bc: (1, 1).
    """
    n_state, n_hidden = w1.shape
    n_action = wa.shape[1]
    assert n_hidden <= LANES and (n_action + 1) <= LANES

    r_wh = _round_up(n_state, 8)          # row where the fused (128,128) head weight starts
    r_bias = r_wh + LANES                 # rows: b1, bh, neg-mask, critic-selector
    P = _round_up(r_bias + 4, 8)

    lane = jnp.arange(LANES)
    params = jnp.zeros((P, LANES), jnp.float32)
    params = params.at[0:n_state, 0:n_hidden].set(w1.astype(jnp.float32))
    params = params.at[r_wh:r_wh + n_hidden, 0:n_action].set(wa.astype(jnp.float32))
    params = params.at[r_wh:r_wh + n_hidden, n_action].set(wc.astype(jnp.float32)[:, 0])
    params = params.at[r_bias + 0, 0:n_hidden].set(b1.astype(jnp.float32).reshape(-1))
    params = params.at[r_bias + 1, 0:n_action].set(ba.astype(jnp.float32).reshape(-1))
    params = params.at[r_bias + 1, n_action].set(bc.astype(jnp.float32).reshape(()))
    params = params.at[r_bias + 2, :].set(
        jnp.where(lane < n_action, 0.0, -1e30).astype(jnp.float32))
    params = params.at[r_bias + 3, :].set(
        jnp.where(lane == n_action, 1.0, 0.0).astype(jnp.float32))
    return params


@functools.partial(jax.jit, static_argnames=("n_action",))
def mlp_forward(x, params, n_action):
    """x: (B, n_state); params: packed blob from pack_params. Returns (actor, critic)."""
    B, n_state = x.shape
    P = params.shape[0]
    r_wh = _round_up(n_state, 8)
    r_bias = r_wh + LANES

    # Narrow packed output: actor probs in lanes [0, n_action), critic at lane n_action.
    OUT_W = min(LANES, max(8, _round_up(n_action + 1, 8)))

    # Batch tiling: params resident in VMEM across the whole grid.
    B8 = _round_up(B, 8)
    TILE_B = min(2048, B8)
    # v7x (2 TCs): make sure a large batch yields >= 2 grid steps to split.
    if B8 >= 1024 and pl.cdiv(B8, TILE_B) < 2:
        TILE_B = _round_up(pl.cdiv(B8, 2), 8)
    grid = pl.cdiv(B, TILE_B)             # ragged tail handled by block machinery

    kernel = functools.partial(
        _mlp_kernel, n_state=n_state, r_wh=r_wh, r_bias=r_bias, out_w=OUT_W)

    out = pl.pallas_call(
        kernel,
        out_shape=jax.ShapeDtypeStruct((B, OUT_W), jnp.float32),
        grid_spec=pltpu.PrefetchScalarGridSpec(
            num_scalar_prefetch=0,
            grid=(grid,),
            in_specs=[
                pl.BlockSpec((TILE_B, n_state), lambda i: (i, 0)),
                pl.BlockSpec((P, LANES), lambda i: (0, 0)),   # weights resident
            ],
            out_specs=pl.BlockSpec((TILE_B, OUT_W), lambda i: (i, 0)),
        ),
        compiler_params=pltpu.CompilerParams(
            dimension_semantics=("parallel",)),               # v7x: 2 TCs share batch axis
    )(x, params)

    actor = out[:, :n_action]
    critic = out[:, n_action:n_action + 1]
    return actor, critic


def init_linear(key, fan_in, fan_out):
    """Deterministic init mirroring PyTorch nn.Linear's uniform(-1/sqrt(fan_in), ...).
    Returns W of shape (fan_in, fan_out) and b of shape (1, fan_out)."""
    kw, kb = jax.random.split(key)
    bound = 1.0 / jnp.sqrt(jnp.float32(fan_in))
    w = jax.random.uniform(kw, (fan_in, fan_out), jnp.float32, -bound, bound)
    b = jax.random.uniform(kb, (1, fan_out), jnp.float32, -bound, bound)
    return w, b


if __name__ == "__main__":
    # CartPole-like shapes: n_state=4, n_action=2, small batch.
    B, n_state, n_hidden, n_action = 8, 4, 64, 2

    key = jax.random.PRNGKey(0)
    kx, k1, k2, k3 = jax.random.split(key, 4)

    x = jax.random.normal(kx, (B, n_state), jnp.float32)
    w1, b1 = init_linear(k1, n_state, n_hidden)
    wa, ba = init_linear(k2, n_hidden, n_action)
    wc, bc = init_linear(k3, n_hidden, 1)

    # Pack once (outside the per-call path), then run the fused kernel.
    params = pack_params(w1, b1, wa, ba, wc, bc)
    actor_out, critic_out = mlp_forward(x, params, n_action)
    jax.block_until_ready((actor_out, critic_out))

    # Reference check in plain JAX (same math).
    h_ref = jnp.maximum(x @ w1 + b1, 0.0)
    actor_ref = jax.nn.softmax(h_ref @ wa + ba, axis=1)
    critic_ref = h_ref @ wc + bc
    assert actor_out.shape == (B, n_action) and critic_out.shape == (B, 1)
    assert jnp.allclose(actor_out, actor_ref, atol=2e-3, rtol=1e-3), "actor mismatch"
    assert jnp.allclose(critic_out, critic_ref, atol=5e-3, rtol=1e-3), "critic mismatch"

    print("KERNEL_OK")
</pallas_src>

<mosaic_0001>
module attributes {stable_mosaic.version = 11 : i64} {
  func.func @_mlp_kernel(%arg0: i32, %arg1: memref<8x4xf32, #tpu.memory_space<vmem>>, %arg2: memref<144x128xf32, #tpu.memory_space<vmem>>, %arg3: memref<8x8xf32, #tpu.memory_space<vmem>>) attributes {dimension_semantics = [#tpu.dimension_semantics<parallel>], iteration_bounds = array<i64: 1>, scalar_prefetch = 0 : i64, scratch_operands = 0 : i64, tpu.core_type = #tpu.core_type<tc>, window_params = [{transform_indices = @transform_0, window_bounds = array<i64: 8, 4>}, {pipeline_mode = #tpu.pipeline_mode<synchronous>, transform_indices = @transform_1, window_bounds = array<i64: 144, 128>}, {transform_indices = @transform_2, window_bounds = array<i64: 8, 8>}]} {
    %c0 = arith.constant 0 : index
    %c0_0 = arith.constant 0 : index
    %0 = vector.load %arg1[%c0, %c0_0] : memref<8x4xf32, #tpu.memory_space<vmem>>, vector<8x4xf32>
    %c0_1 = arith.constant 0 : index
    %c0_2 = arith.constant 0 : index
    %1 = vector.load %arg2[%c0_1, %c0_2] : memref<144x128xf32, #tpu.memory_space<vmem>>, vector<4x128xf32>
    %c8 = arith.constant 8 : index
    %c0_3 = arith.constant 0 : index
    %2 = vector.load %arg2[%c8, %c0_3] : memref<144x128xf32, #tpu.memory_space<vmem>>, vector<128x128xf32>
    %c136 = arith.constant 136 : index
    %c0_4 = arith.constant 0 : index
    %3 = vector.load %arg2[%c136, %c0_4] : memref<144x128xf32, #tpu.memory_space<vmem>>, vector<1x128xf32>
    %c137 = arith.constant 137 : index
    %c0_5 = arith.constant 0 : index
    %4 = vector.load %arg2[%c137, %c0_5] : memref<144x128xf32, #tpu.memory_space<vmem>>, vector<1x128xf32>
    %c138 = arith.constant 138 : index
    %c0_6 = arith.constant 0 : index
    %5 = vector.load %arg2[%c138, %c0_6] : memref<144x128xf32, #tpu.memory_space<vmem>>, vector<1x128xf32>
    %c139 = arith.constant 139 : index
    %c0_7 = arith.constant 0 : index
    %6 = vector.load %arg2[%c139, %c0_7] : memref<144x128xf32, #tpu.memory_space<vmem>>, vector<1x128xf32>
    %cst = arith.constant dense<0.000000e+00> : vector<8x128xf32>
    %7 = tpu.matmul %0, %1, %cst {dimension_numbers = #tpu.dot_dimension_numbers<[1], [0], [0], [1], [0, 0, 1, 1], [], []>} : vector<8x4xf32>, vector<4x128xf32>, vector<8x128xf32> -> vector<8x128xf32>
    %8 = vector.broadcast %3 : vector<1x128xf32> to vector<8x128xf32>
    %9 = arith.addf %7, %8 : vector<8x128xf32>
    %cst_8 = arith.constant 0.000000e+00 : f32
    %10 = vector.broadcast %cst_8 : f32 to vector<8x128xf32>
    %11 = arith.maximumf %9, %10 : vector<8x128xf32>
    %cst_9 = arith.constant dense<0.000000e+00> : vector<8x128xf32>
    %12 = tpu.matmul %11, %2, %cst_9 {dimension_numbers = #tpu.dot_dimension_numbers<[1], [0], [0], [1], [0, 0, 1, 1], [], []>} : vector<8x128xf32>, vector<128x128xf32>, vector<8x128xf32> -> vector<8x128xf32>
    %13 = vector.broadcast %4 : vector<1x128xf32> to vector<8x128xf32>
    %14 = arith.addf %12, %13 : vector<8x128xf32>
    %15 = vector.broadcast %5 : vector<1x128xf32> to vector<8x128xf32>
    %16 = arith.addf %14, %15 : vector<8x128xf32>
    %cst_10 = arith.constant dense<0xFF800000> : vector<8xf32>
    %17 = vector.multi_reduction <maximumf>, %16, %cst_10 [1] : vector<8x128xf32> to vector<8xf32>
    %18 = vector.shape_cast %17 : vector<8xf32> to vector<8x1xf32>
    %19 = vector.broadcast %18 : vector<8x1xf32> to vector<8x128xf32>
    %20 = arith.subf %16, %19 : vector<8x128xf32>
    %21 = math.exp %20 : vector<8x128xf32>
    %cst_11 = arith.constant dense<0.000000e+00> : vector<8xf32>
    %22 = vector.multi_reduction <add>, %21, %cst_11 [1] : vector<8x128xf32> to vector<8xf32>
    %23 = vector.shape_cast %22 : vector<8xf32> to vector<8x1xf32>
    %24 = vector.broadcast %23 : vector<8x1xf32> to vector<8x128xf32>
    %25 = arith.divf %21, %24 : vector<8x128xf32>
    %26 = vector.broadcast %6 : vector<1x128xf32> to vector<8x128xf32>
    %27 = arith.mulf %14, %26 : vector<8x128xf32>
    %28 = arith.addf %25, %27 : vector<8x128xf32>
    %29 = vector.extract_strided_slice %28 {offsets = [0, 0], sizes = [8, 8], strides = [1, 1]} : vector<8x128xf32> to vector<8x8xf32>
    %c0_12 = arith.constant 0 : index
    %c0_13 = arith.constant 0 : index
    %30 = vector.load %arg3[%c0_12, %c0_13] : memref<8x8xf32, #tpu.memory_space<vmem>>, vector<8x8xf32>
    tpu.vector_store %arg3[%c0_12, %c0_13], %29 {strides = array<i32>} : memref<8x8xf32, #tpu.memory_space<vmem>>, vector<8x8xf32>,
    return
  }
  func.func @transform_0(%arg0: i32) -> (i32, i32) {
    %c0_i32 = arith.constant 0 : i32
    %c0_i32_0 = arith.constant 0 : i32
    return %arg0, %c0_i32 : i32, i32
  }
  func.func @transform_1(%arg0: i32) -> (i32, i32) {
    %c0_i32 = arith.constant 0 : i32
    %c0_i32_0 = arith.constant 0 : i32
    %c0_i32_1 = arith.constant 0 : i32
    return %c0_i32, %c0_i32_0 : i32, i32
  }
  func.func @transform_2(%arg0: i32) -> (i32, i32) {
    %c0_i32 = arith.constant 0 : i32
    %c0_i32_0 = arith.constant 0 : i32
    return %arg0, %c0_i32 : i32, i32
  }
}

</mosaic_0001>

<bundles_post_ra>
// kernel: mlp_forward.1
= control target key start
LH: loop header
LB: loop body
LE: loop exit
PB: predicated region body
PF: predicated region fallthrough
CT: control target
= control target key end

     0   :  { %7 = vsyncpa [#allocation3], 0  ;;  %s327_s9 = smov [#allocation2]   ;;  %s356_s0 = inlined_call_operand.vmem [shape: f32[8,4], index: 0, kind: input, shape index: {}]   ;;  %s357_s1 = inlined_call_operand.hbm [shape: f32[144,128], index: 1, kind: input, shape index: {}]   ;;  %s358_s2 = inlined_call_operand.vmem [shape: f32[8,8], index: 2, kind: output, shape index: {}]  }
   0x1   :  { %s15_s10 = sshll.u32 %s327_s9, 4  ;;  %s16_s10 = int_to_ptr.vmem [resolvable:$true] %s15_s10 }
   0x2   :  { %s313_s11 = scalar_lea.vmem %s16_s10, 2304  ;;  %p318_p1 = scmp.lt.s32.totalorder %s16_s10, %s16_s10 }
   0x3   :  { %p314_p0 = scmp.ne.s32.totalorder %s16_s10, %s313_s11  ;;  %p319_p2 = scmp.lt.s32.totalorder %s313_s11, %s313_s11 }
   0x5   :  { %p320_p3 = por %p319_p2, %p318_p1 }
   0x7   :  { %p321_p4 = pnand %p320_p3, %p314_p0 }
   0x9   :  { %324 = shalt.err (!%p321_p4)
}
   0xa   :  { %s328_s12 = smov 128   ;;  %s329_s13 = smov 8  }
   0xb   :  { %21 = dma.hbm_to_vmem [thread:$0]  %s357_s1, 2304, %s16_s10, [#allocation3], %s328_s12, %s328_s12, %s329_s13  }
   0xc   :  { %325 = dma.done.wait [#allocation3], 2304  }
   0xd   :  { %326 = vsyncadd [#allocation3], 4294964992  ;;  %v330_v0 = vmov 0.0   ;;  %vm331_vm0 = vmmov 0   ;;  %vm55_vm1 = vcmask 1043456   ;;  %vm51_vm2 = vcmask 31744  }
   0xe   :  { %256 = vmatprep.subr.mxu0 %v330_v0  ;;  %258 = vmatprep.mubr.msk.f32.mxu0 %vm331_vm0, %v330_v0  ;;  %v26_v1 = vld [vmem:[#allocation2] sm:$0xf]  ;;  %v41_v4 = vld [vmem:[#allocation2 + $0x78] sm:$0xff]  ;;  %v40_v5 = vld [vmem:[#allocation2 + $0x70] sm:$0xff]  ;;  %vm224_vm3 = vcmask 64512  }
   0xf   :  { %261 = vmatprep.subr.mxu1 %v330_v0  ;;  %293 = vmatprep.mubr.msk.f32.mxu1 %vm331_vm0, %v330_v0  ;;  %v25_v2 = vld [vmem:[%s356_s0] sm:$0xff]  ;;  %v39_v6 = vld [vmem:[#allocation2 + $0x68] sm:$0xff]  ;;  %v37_v8 = vld [vmem:[#allocation2 + $0x58] sm:$0xff] }
  0x10   :  { %v42_v3 = vld [vmem:[#allocation2 + $0x80] sm:$0xff]  ;;  %257 = vmatpush3.msk.msra.mxu0 %vm55_vm1, %v26_v1  ;;  %v36_v9 = vld [vmem:[#allocation2 + $0x50] sm:$0xff]  ;;  %v35_v10 = vld [vmem:[#allocation2 + $0x48] sm:$0xff] }
  0x11   :  { %262 = vmatpush3.msra.mxu1 %v42_v3  ;;  %259 = vmatmul.mubr.msk.f32.vlgmr.msra.gmra.mxu0 %vm51_vm2, %v25_v2  ;;  %v38_v7 = vld [vmem:[#allocation2 + $0x60] sm:$0xff]  ;;  %v33_v12 = vld [vmem:[#allocation2 + $0x38] sm:$0xff]  ;;  %v32_v13 = vld [vmem:[#allocation2 + $0x30] sm:$0xff] }
  0x12   :  { %263 = vmatprep.subr.mxu1 %v330_v0  ;;  %v34_v11 = vld [vmem:[#allocation2 + $0x40] sm:$0xff]  ;;  %v31_v14 = vld [vmem:[#allocation2 + $0x28] sm:$0xff]  ;;  %v29_v16 = vld [vmem:[#allocation2 + $0x18] sm:$0xff] }
  0x13   :  { %264 = vmatpush3.msra.mxu1 %v41_v4  ;;  %v30_v15 = vld [vmem:[#allocation2 + $0x20] sm:$0xff]  ;;  %v28_v17 = vld [vmem:[#allocation2 + $0x10] sm:$0xff]  ;;  %v27_v18 = vld [vmem:[#allocation2 + $0x8] sm:$0xff] }
  0x14   :  { %265 = vmatprep.subr.mxu1 %v330_v0  ;;  %v231_v19 = vld [vmem:[#allocation2 + $0x88] ss:$0 sm:$0xff]  ;;  %v234_v24 = vld [vmem:[#allocation2 + $0x89] ss:$0 sm:$0xff]  ;;  %v235_v26 = vld [vmem:[#allocation2 + $0x8a] ss:$0 sm:$0xff] }
  0x15   :  { %266 = vmatpush3.msra.mxu1 %v40_v5  ;;  %v236_v35 = vld [vmem:[#allocation2 + $0x8b] ss:$0 sm:$0xff] }
  0x16   :  { %267 = vmatprep.subr.mxu1 %v330_v0 }
  0x17   :  { %268 = vmatpush3.msra.mxu1 %v39_v6 }
  0x18   :  { %269 = vmatprep.subr.mxu1 %v330_v0 }
  0x19   :  { %270 = vmatpush3.msra.mxu1 %v38_v7 }
  0x1a   :  { %271 = vmatprep.subr.mxu1 %v330_v0 }
  0x1b   :  { %272 = vmatpush3.msra.mxu1 %v37_v8 }
  0x1c   :  { %273 = vmatprep.subr.mxu1 %v330_v0 }
  0x1d   :  { %274 = vmatpush3.msra.mxu1 %v36_v9 }
  0x1e   :  { %275 = vmatprep.subr.mxu1 %v330_v0 }
  0x1f   :  { %276 = vmatpush3.msra.mxu1 %v35_v10 }
  0x20   :  { %277 = vmatprep.subr.mxu1 %v330_v0 }
  0x21   :  { %278 = vmatpush3.msra.mxu1 %v34_v11 }
  0x22   :  { %279 = vmatprep.subr.mxu1 %v330_v0 }
  0x23   :  { %280 = vmatpush3.msra.mxu1 %v33_v12 }
  0x24   :  { %281 = vmatprep.subr.mxu1 %v330_v0 }
  0x25   :  { %282 = vmatpush3.msra.mxu1 %v32_v13 }
  0x26   :  { %283 = vmatprep.subr.mxu1 %v330_v0 }
  0x27   :  { %284 = vmatpush3.msra.mxu1 %v31_v14 }
  0x28   :  { %285 = vmatprep.subr.mxu1 %v330_v0 }
  0x29   :  { %286 = vmatpush3.msra.mxu1 %v30_v15 }
  0x2a   :  { %287 = vmatprep.subr.mxu1 %v330_v0 }
  0x2b   :  { %288 = vmatpush3.msra.mxu1 %v29_v16 }
  0x2c   :  { %289 = vmatprep.subr.mxu1 %v330_v0 }
  0x2d   :  { %290 = vmatpush3.msra.mxu1 %v28_v17 }
  0x2e   :  { %291 = vmatprep.subr.mxu1 %v330_v0 }
  0x2f   :  { %292 = vmatpush3.msra.mxu1 %v27_v18 }
  0xd1   :  { %v125_v20 = vpop.f32.mrf.mxu0 }
  0xd2   :  { %v126_v21 = vadd.f32 %v231_v19, %v125_v20 }
  0xd3   :  { %v260_v22 = vpop.f32.mrf.mxu0 }
  0xd4   :  { %v129_v23 = vmax.f32 %v126_v21, 0.0 }
  0xd6   :  { %294 = vmatmul.mubr.f32.vlgmr.msra.gmra.mxu1 %v129_v23 }
 0x196   :  { %v200_v25 = vpop.f32.mrf.mxu1 }
 0x197   :  { %v201_v27 = vadd.f32 %v234_v24, %v200_v25 }
 0x198   :  { %v295_v28 = vpop.f32.mrf.mxu1 }
 0x199   :  { %v208_v29 = vadd.f32 %v235_v26, %v201_v27  ;;  %v222_v37 = vmul.f32 %v236_v35, %v201_v27 }
 0x19b   :  { %209 = vmax.xlane.f32.xlu0 %v208_v29 }
 0x224   :  { %v210_v30 = vpop.xlane.xlu0 %209 }
 0x225   :  { %v211_v31 = vsub.f32 %v208_v29, %v210_v30 }
 0x227   :  { %v212_v32 = vmul.f32 1.442695, %v211_v31 }
 0x229   :  { %301 = vpow2.f32 %v212_v32 }
 0x236   :  { %v302_v33 = vpop.eup %301 }
 0x237   :  { %214 = vadd.xlane.f32.xlu0 %v302_v33 }
 0x2c0   :  { %v215_v34 = vpop.xlane.xlu0 %214 }
 0x2c1   :  { %303 = vrcp.f32 %v215_v34 }
 0x2ce   :  { %v304_v36 = vpop.eup %303 }
 0x2cf   :  { %v217_v38 = vmul.f32 %v304_v36, %v302_v33 }
 0x2d1   :  { %v223_v39 = vadd.f32 %v222_v37, %v217_v38 }
 0x2d3   :  { %225 = vst.msk [vmem:[%s358_s2] sm:$0xff] %vm224_vm3, %v223_v39 }
 0x2d4   :  { %230 = vsyncpa [#allocation3], 1 }

</bundles_post_ra>
